<compile_context>
chip_gen: v7x
topology: tpu7x:2x2x1
jax: 0.10.0
libtpu: 0.0.40
codegen_flags: <defaults>
</compile_context>

<pallas_src>
import itertools
import numpy as np
import jax
import jax.numpy as jnp
from jax.experimental import pallas as pl
from jax.experimental.pallas import tpu as pltpu  # noqa: F401  (TPU backend assumed)


def _level_lane_constants(stride, wc, anchor_scale, scales, ratios):
    """Build the (2, wc*A*4) float32 lane-constant table for one pyramid level.

    Lane index l decomposes as l = (x * A + a) * 4 + c with coordinate order
    [y1, x1, y2, x2] and anchor order = itertools.product(scales, ratios)
    (scale-major, ratio-minor), matching the PyTorch reference.
      row 0: 1.0 if the lane holds a y coordinate (c in {0, 2}) else 0.0
      row 1: everything except the y-center term, i.e.
             c==0: -ay2[a]        c==1: x_center - ax2[a]
             c==2: +ay2[a]        c==3: x_center + ax2[a]
    Computed in float64 and cast once to float32 (like the reference).
    """
    n_anchors = len(scales) * len(ratios)
    ax2 = np.empty(n_anchors, np.float64)
    ay2 = np.empty(n_anchors, np.float64)
    for k, (scale, ratio) in enumerate(itertools.product(scales, ratios)):
        base = float(anchor_scale) * float(stride) * float(scale)
        ax2[k] = base * float(ratio[0]) / 2.0
        ay2[k] = base * float(ratio[1]) / 2.0

    lane = np.arange(wc * n_anchors * 4)
    c = lane % 4
    a = (lane // 4) % n_anchors
    x = lane // (4 * n_anchors)
    x_center = x * float(stride) + float(stride) / 2.0
    is_y = (c % 2 == 0)
    sign = np.where(c >= 2, 1.0, -1.0)
    const = np.where(is_y, sign * ay2[a], x_center + sign * ax2[a])
    mask = is_y.astype(np.float64)
    return np.stack([mask, const], axis=0).astype(np.float32)  # (2, W)


def _make_fused_kernel(strides, hcs, out_dtype):
    """One kernel body producing every pyramid level's lane-dense anchor slab."""
    n_levels = len(strides)

    def kernel(*refs):
        const_refs = refs[:n_levels]
        out_refs = refs[n_levels:]
        for i in range(n_levels):
            stride = float(strides[i])
            hc = hcs[i]
            # y-center per output row: y * stride + stride / 2  (sublane iota).
            cy = jax.lax.broadcasted_iota(jnp.int32, (hc, 1), 0).astype(jnp.float32)
            cy = cy * jnp.float32(stride) + jnp.float32(stride / 2.0)
            cvals = const_refs[i][...]          # (2, W) f32, W = wc * A * 4
            mask = cvals[0:1, :]                # (1, W) is-y-coordinate mask
            add = cvals[1:2, :]                 # (1, W) x-center + signed half extent
            out_refs[i][...] = (cy * mask + add).astype(out_dtype)

    return kernel


class Anchors:
    """JAX/Pallas port of the EfficientDet `Anchors` module (forward only)."""

    def __init__(self, anchor_scale=4.0, pyramid_levels=None, **kwargs):
        self.anchor_scale = anchor_scale
        self.pyramid_levels = [3, 4, 5, 6, 7] if pyramid_levels is None else pyramid_levels
        self.strides = kwargs.get('strides', [2 ** x for x in self.pyramid_levels])
        self.scales = list(kwargs.get('scales', [2 ** 0, 2 ** (1.0 / 3.0), 2 ** (2.0 / 3.0)]))
        self.ratios = kwargs.get('ratios', [(1.0, 1.0), (1.4, 0.7), (0.7, 1.4)])
        # TODO(synk): torch version caches per torch.device; here we cache per (H, W, dtype).
        self._cache = {}

    def __call__(self, image, dtype=jnp.float32):
        h, w = int(image.shape[2]), int(image.shape[3])
        # Mirror the torch module: float16 stays float16, everything else -> float32.
        out_dtype = jnp.float16 if jnp.dtype(dtype) == jnp.dtype(jnp.float16) else jnp.float32
        key = (h, w, jnp.dtype(out_dtype).name)
        if key in self._cache:
            return self._cache[key]

        n_anchors = len(self.scales) * len(self.ratios)
        hcs, consts, out_shapes = [], [], []
        for stride in self.strides:
            if w % stride != 0:
                raise ValueError('input size must be divided by the stride.')
            # Match np.arange(stride/2, size, stride) counts of the reference exactly.
            hc = int(np.arange(stride / 2.0, h, stride).shape[0])
            wc = int(np.arange(stride / 2.0, w, stride).shape[0])
            hcs.append(hc)
            consts.append(jnp.asarray(
                _level_lane_constants(stride, wc, self.anchor_scale, self.scales, self.ratios)))
            out_shapes.append(jax.ShapeDtypeStruct((hc, wc * n_anchors * 4), out_dtype))

        kernel = _make_fused_kernel(self.strides, hcs, out_dtype)
        # Single launch, no grid: whole-array (VMEM) blocks for all inputs/outputs.
        level_outs = pl.pallas_call(
            kernel,
            out_shape=tuple(out_shapes),
        )(*consts)

        # Layout plumbing only: (hc, wc*A*4) -> (hc*wc*A, 4) keeps reference ordering.
        anchor_boxes = jnp.concatenate(
            [o.reshape(-1, 4) for o in level_outs], axis=0)[None]  # (1, N, 4)
        self._cache[key] = anchor_boxes
        return anchor_boxes


def anchors_reference(image_shape, strides, scales, ratios, anchor_scale, dtype=np.float32):
    """Direct numpy transcription of the PyTorch forward (for verification)."""
    boxes_all = []
    for stride in strides:
        boxes_level = []
        for scale, ratio in itertools.product(scales, ratios):
            base_anchor_size = anchor_scale * stride * scale
            anchor_size_x_2 = base_anchor_size * ratio[0] / 2.0
            anchor_size_y_2 = base_anchor_size * ratio[1] / 2.0
            x = np.arange(stride / 2, image_shape[1], stride)
            y = np.arange(stride / 2, image_shape[0], stride)
            xv, yv = np.meshgrid(x, y)
            xv = xv.reshape(-1)
            yv = yv.reshape(-1)
            boxes = np.vstack((yv - anchor_size_y_2, xv - anchor_size_x_2,
                               yv + anchor_size_y_2, xv + anchor_size_x_2))
            boxes = np.swapaxes(boxes, 0, 1)
            boxes_level.append(np.expand_dims(boxes, axis=1))
        boxes_level = np.concatenate(boxes_level, axis=1)
        boxes_all.append(boxes_level.reshape([-1, 4]))
    return np.vstack(boxes_all).astype(dtype)[None]


if __name__ == "__main__":
    key = jax.random.PRNGKey(0)
    # H = W = 128 so the image is divisible by the largest default stride 2^7 = 128.
    image = jax.random.normal(key, (2, 4, 128, 128), dtype=jnp.float32)

    anchors = Anchors(anchor_scale=4.0)
    out = anchors(image)
    out = jax.block_until_ready(out)

    ref = anchors_reference(
        (image.shape[2], image.shape[3]),
        anchors.strides, anchors.scales, anchors.ratios, anchors.anchor_scale)

    assert out.shape == ref.shape, (out.shape, ref.shape)
    assert out.dtype == jnp.float32
    assert np.allclose(np.asarray(out), ref, rtol=1e-5, atol=1e-3), "mismatch vs reference"

    # Second call hits the per-shape cache (no device work in steady state).
    out2 = anchors(image)
    assert out2.shape == ref.shape

    print("KERNEL_OK")
</pallas_src>

<mosaic_0001>
module attributes {stable_mosaic.version = 11 : i64} {
  func.func @kernel(%arg0: memref<2x576xf32, #tpu.memory_space<vmem>>, %arg1: memref<2x288xf32, #tpu.memory_space<vmem>>, %arg2: memref<2x144xf32, #tpu.memory_space<vmem>>, %arg3: memref<2x72xf32, #tpu.memory_space<vmem>>, %arg4: memref<2x36xf32, #tpu.memory_space<vmem>>, %arg5: memref<16x576xf32, #tpu.memory_space<vmem>>, %arg6: memref<8x288xf32, #tpu.memory_space<vmem>>, %arg7: memref<4x144xf32, #tpu.memory_space<vmem>>, %arg8: memref<2x72xf32, #tpu.memory_space<vmem>>, %arg9: memref<1x36xf32, #tpu.memory_space<vmem>>) attributes {dimension_semantics = [], scalar_prefetch = 0 : i64, scratch_operands = 0 : i64, tpu.core_type = #tpu.core_type<tc>} {
    %0 = tpu.iota {dimensions = array<i32: 0>} : vector<16x1xi32>
    %1 = arith.sitofp %0 : vector<16x1xi32> to vector<16x1xf32>
    %cst = arith.constant 8.000000e+00 : f32
    %2 = vector.broadcast %cst : f32 to vector<16x1xf32>
    %3 = arith.mulf %1, %2 : vector<16x1xf32>
    %cst_0 = arith.constant 4.000000e+00 : f32
    %4 = vector.broadcast %cst_0 : f32 to vector<16x1xf32>
    %5 = arith.addf %3, %4 : vector<16x1xf32>
    %c0 = arith.constant 0 : index
    %c0_1 = arith.constant 0 : index
    %6 = vector.load %arg0[%c0, %c0_1] : memref<2x576xf32, #tpu.memory_space<vmem>>, vector<2x576xf32>
    %7 = vector.extract_strided_slice %6 {offsets = [0, 0], sizes = [1, 576], strides = [1, 1]} : vector<2x576xf32> to vector<1x576xf32>
    %8 = vector.extract_strided_slice %6 {offsets = [1, 0], sizes = [1, 576], strides = [1, 1]} : vector<2x576xf32> to vector<1x576xf32>
    %9 = vector.broadcast %5 : vector<16x1xf32> to vector<16x576xf32>
    %10 = vector.broadcast %7 : vector<1x576xf32> to vector<16x576xf32>
    %11 = arith.mulf %9, %10 : vector<16x576xf32>
    %12 = vector.broadcast %8 : vector<1x576xf32> to vector<16x576xf32>
    %13 = arith.addf %11, %12 : vector<16x576xf32>
    %c0_2 = arith.constant 0 : index
    %c0_3 = arith.constant 0 : index
    %14 = vector.load %arg5[%c0_2, %c0_3] : memref<16x576xf32, #tpu.memory_space<vmem>>, vector<16x576xf32>
    tpu.vector_store %arg5[%c0_2, %c0_3], %13 {strides = array<i32>} : memref<16x576xf32, #tpu.memory_space<vmem>>, vector<16x576xf32>,
    %15 = tpu.iota {dimensions = array<i32: 0>} : vector<8x1xi32>
    %16 = arith.sitofp %15 : vector<8x1xi32> to vector<8x1xf32>
    %cst_4 = arith.constant 1.600000e+01 : f32
    %17 = vector.broadcast %cst_4 : f32 to vector<8x1xf32>
    %18 = arith.mulf %16, %17 : vector<8x1xf32>
    %cst_5 = arith.constant 8.000000e+00 : f32
    %19 = vector.broadcast %cst_5 : f32 to vector<8x1xf32>
    %20 = arith.addf %18, %19 : vector<8x1xf32>
    %c0_6 = arith.constant 0 : index
    %c0_7 = arith.constant 0 : index
    %21 = vector.load %arg1[%c0_6, %c0_7] : memref<2x288xf32, #tpu.memory_space<vmem>>, vector<2x288xf32>
    %22 = vector.extract_strided_slice %21 {offsets = [0, 0], sizes = [1, 288], strides = [1, 1]} : vector<2x288xf32> to vector<1x288xf32>
    %23 = vector.extract_strided_slice %21 {offsets = [1, 0], sizes = [1, 288], strides = [1, 1]} : vector<2x288xf32> to vector<1x288xf32>
    %24 = vector.broadcast %20 : vector<8x1xf32> to vector<8x288xf32>
    %25 = vector.broadcast %22 : vector<1x288xf32> to vector<8x288xf32>
    %26 = arith.mulf %24, %25 : vector<8x288xf32>
    %27 = vector.broadcast %23 : vector<1x288xf32> to vector<8x288xf32>
    %28 = arith.addf %26, %27 : vector<8x288xf32>
    %c0_8 = arith.constant 0 : index
    %c0_9 = arith.constant 0 : index
    %29 = vector.load %arg6[%c0_8, %c0_9] : memref<8x288xf32, #tpu.memory_space<vmem>>, vector<8x288xf32>
    tpu.vector_store %arg6[%c0_8, %c0_9], %28 {strides = array<i32>} : memref<8x288xf32, #tpu.memory_space<vmem>>, vector<8x288xf32>,
    %30 = tpu.iota {dimensions = array<i32: 0>} : vector<4x1xi32>
    %31 = arith.sitofp %30 : vector<4x1xi32> to vector<4x1xf32>
    %cst_10 = arith.constant 3.200000e+01 : f32
    %32 = vector.broadcast %cst_10 : f32 to vector<4x1xf32>
    %33 = arith.mulf %31, %32 : vector<4x1xf32>
    %cst_11 = arith.constant 1.600000e+01 : f32
    %34 = vector.broadcast %cst_11 : f32 to vector<4x1xf32>
    %35 = arith.addf %33, %34 : vector<4x1xf32>
    %c0_12 = arith.constant 0 : index
    %c0_13 = arith.constant 0 : index
    %36 = vector.load %arg2[%c0_12, %c0_13] : memref<2x144xf32, #tpu.memory_space<vmem>>, vector<2x144xf32>
    %37 = vector.extract_strided_slice %36 {offsets = [0, 0], sizes = [1, 144], strides = [1, 1]} : vector<2x144xf32> to vector<1x144xf32>
    %38 = vector.extract_strided_slice %36 {offsets = [1, 0], sizes = [1, 144], strides = [1, 1]} : vector<2x144xf32> to vector<1x144xf32>
    %39 = vector.broadcast %35 : vector<4x1xf32> to vector<4x144xf32>
    %40 = vector.broadcast %37 : vector<1x144xf32> to vector<4x144xf32>
    %41 = arith.mulf %39, %40 : vector<4x144xf32>
    %42 = vector.broadcast %38 : vector<1x144xf32> to vector<4x144xf32>
    %43 = arith.addf %41, %42 : vector<4x144xf32>
    %c0_14 = arith.constant 0 : index
    %c0_15 = arith.constant 0 : index
    %44 = vector.load %arg7[%c0_14, %c0_15] : memref<4x144xf32, #tpu.memory_space<vmem>>, vector<4x144xf32>
    tpu.vector_store %arg7[%c0_14, %c0_15], %43 {strides = array<i32>} : memref<4x144xf32, #tpu.memory_space<vmem>>, vector<4x144xf32>,
    %45 = tpu.iota {dimensions = array<i32: 0>} : vector<2x1xi32>
    %46 = arith.sitofp %45 : vector<2x1xi32> to vector<2x1xf32>
    %cst_16 = arith.constant 6.400000e+01 : f32
    %47 = vector.broadcast %cst_16 : f32 to vector<2x1xf32>
    %48 = arith.mulf %46, %47 : vector<2x1xf32>
    %cst_17 = arith.constant 3.200000e+01 : f32
    %49 = vector.broadcast %cst_17 : f32 to vector<2x1xf32>
    %50 = arith.addf %48, %49 : vector<2x1xf32>
    %c0_18 = arith.constant 0 : index
    %c0_19 = arith.constant 0 : index
    %51 = vector.load %arg3[%c0_18, %c0_19] : memref<2x72xf32, #tpu.memory_space<vmem>>, vector<2x72xf32>
    %52 = vector.extract_strided_slice %51 {offsets = [0, 0], sizes = [1, 72], strides = [1, 1]} : vector<2x72xf32> to vector<1x72xf32>
    %53 = vector.extract_strided_slice %51 {offsets = [1, 0], sizes = [1, 72], strides = [1, 1]} : vector<2x72xf32> to vector<1x72xf32>
    %54 = vector.broadcast %50 : vector<2x1xf32> to vector<2x72xf32>
    %55 = vector.broadcast %52 : vector<1x72xf32> to vector<2x72xf32>
    %56 = arith.mulf %54, %55 : vector<2x72xf32>
    %57 = vector.broadcast %53 : vector<1x72xf32> to vector<2x72xf32>
    %58 = arith.addf %56, %57 : vector<2x72xf32>
    %c0_20 = arith.constant 0 : index
    %c0_21 = arith.constant 0 : index
    %59 = vector.load %arg8[%c0_20, %c0_21] : memref<2x72xf32, #tpu.memory_space<vmem>>, vector<2x72xf32>
    tpu.vector_store %arg8[%c0_20, %c0_21], %58 {strides = array<i32>} : memref<2x72xf32, #tpu.memory_space<vmem>>, vector<2x72xf32>,
    %60 = tpu.iota {dimensions = array<i32: 0>} : vector<1x1xi32>
    %61 = arith.sitofp %60 : vector<1x1xi32> to vector<1x1xf32>
    %cst_22 = arith.constant 1.280000e+02 : f32
    %62 = vector.broadcast %cst_22 : f32 to vector<1x1xf32>
    %63 = arith.mulf %61, %62 : vector<1x1xf32>
    %cst_23 = arith.constant 6.400000e+01 : f32
    %64 = vector.broadcast %cst_23 : f32 to vector<1x1xf32>
    %65 = arith.addf %63, %64 : vector<1x1xf32>
    %c0_24 = arith.constant 0 : index
    %c0_25 = arith.constant 0 : index
    %66 = vector.load %arg4[%c0_24, %c0_25] : memref<2x36xf32, #tpu.memory_space<vmem>>, vector<2x36xf32>
    %67 = vector.extract_strided_slice %66 {offsets = [0, 0], sizes = [1, 36], strides = [1, 1]} : vector<2x36xf32> to vector<1x36xf32>
    %68 = vector.extract_strided_slice %66 {offsets = [1, 0], sizes = [1, 36], strides = [1, 1]} : vector<2x36xf32> to vector<1x36xf32>
    %69 = vector.broadcast %65 : vector<1x1xf32> to vector<1x36xf32>
    %70 = arith.mulf %69, %67 : vector<1x36xf32>
    %71 = arith.addf %70, %68 : vector<1x36xf32>
    %c0_26 = arith.constant 0 : index
    %c0_27 = arith.constant 0 : index
    %72 = vector.load %arg9[%c0_26, %c0_27] : memref<1x36xf32, #tpu.memory_space<vmem>>, vector<1x36xf32>
    tpu.vector_store %arg9[%c0_26, %c0_27], %71 {strides = array<i32>} : memref<1x36xf32, #tpu.memory_space<vmem>>, vector<1x36xf32>,
    return
  }
}

</mosaic_0001>

<bundles_post_ra>
// kernel: tpu_custom_call.1
= control target key start
LH: loop header
LB: loop body
LE: loop exit
PB: predicated region body
PF: predicated region fallthrough
CT: control target
= control target key end

     0   :  { %15 = vsyncpa [#allocation3], 0  ;;  %s870_s0 = inlined_call_operand.hbm [shape: f32[2,576], index: 0, kind: input, shape index: {}]   ;;  %s871_s1 = inlined_call_operand.hbm [shape: f32[2,288], index: 1, kind: input, shape index: {}]   ;;  %s872_s2 = inlined_call_operand.vmem [shape: f32[2,144], index: 2, kind: input, shape index: {}]   ;;  %s873_s3 = inlined_call_operand.vmem [shape: f32[2,72], index: 3, kind: input, shape index: {}]   ;;  %s874_s4 = inlined_call_operand.vmem [shape: f32[2,36], index: 4, kind: input, shape index: {}]   ;;  %s875_s5 = inlined_call_operand.hbm [shape: f32[16,576], index: 5, kind: output, shape index: {0}]   ;;  %s876_s6 = inlined_call_operand.hbm [shape: f32[8,288], index: 6, kind: output, shape index: {1}]   ;;  %s877_s7 = inlined_call_operand.hbm [shape: f32[4,144], index: 7, kind: output, shape index: {2}]   ;;  %s878_s8 = inlined_call_operand.hbm [shape: f32[2,72], index: 8, kind: output, shape index: {3}]   ;;  %s879_s9 = inlined_call_operand.hbm [shape: f32[1,36], index: 9, kind: output, shape index: {4}]  }
   0x1   :  { %16 = vsyncpa [#allocation6], 0 }
   0x2   :  { %17 = vsyncpa [#allocation4], 0 }
   0x3   :  { %18 = vsyncpa [#allocation9], 0 }
   0x4   :  { %19 = vsyncpa [#allocation12], 0  ;;  %s576_s30 = smov [#allocation2]   ;;  %s577_s11 = smov [#allocation5]  }
   0x5   :  { %s26_s10 = sshll.u32 %s576_s30, 4  ;;  %s36_s12 = sshll.u32 %s577_s11, 4  ;;  %s27_s10 = int_to_ptr.vmem [resolvable:$true] %s26_s10  ;;  %s37_s12 = int_to_ptr.vmem [resolvable:$true] %s36_s12 }
   0x6   :  { %s412_s15 = scalar_lea.hbm %s870_s0, 160 }
   0x7   :  { %p413_p0 = scmp.ne.s32.totalorder %s870_s0, %s412_s15  ;;  %p416_p1 = scmp.lt.u32.totalorder %s412_s15, %s870_s0 }
   0x9   :  { %p418_p2 = pnand %p416_p1, %p413_p0 }
   0xb   :  { %421 = shalt.err (!%p418_p2)
}
   0xc   :  { %s422_s20 = scalar_lea.vmem %s27_s10, 160  ;;  %p427_p4 = scmp.lt.s32.totalorder %s27_s10, %s27_s10 }
   0xd   :  { %p423_p3 = scmp.ne.s32.totalorder %s27_s10, %s422_s20  ;;  %p428_p5 = scmp.lt.s32.totalorder %s422_s20, %s422_s20 }
   0xf   :  { %p429_p6 = por %p428_p5, %p427_p4 }
  0x11   :  { %p430_p7 = pnand %p429_p6, %p423_p3 }
  0x13   :  { %433 = shalt.err (!%p430_p7)
}
  0x14   :  { %29 = dma.hbm_to_vmem [thread:$0]  %s870_s0, 160, %s27_s10, [#allocation3]  }
  0x15   :  { %s434_s25 = scalar_lea.hbm %s871_s1, 96 }
  0x16   :  { %p435_p8 = scmp.ne.s32.totalorder %s871_s1, %s434_s25  ;;  %p438_p9 = scmp.lt.u32.totalorder %s434_s25, %s871_s1 }
  0x18   :  { %p440_p10 = pnand %p438_p9, %p435_p8 }
  0x1a   :  { %443 = shalt.err (!%p440_p10)
}
  0x1b   :  { %s444_s30 = scalar_lea.vmem %s37_s12, 96  ;;  %p449_p12 = scmp.lt.s32.totalorder %s37_s12, %s37_s12 }
  0x1c   :  { %p445_p11 = scmp.ne.s32.totalorder %s37_s12, %s444_s30  ;;  %p450_p13 = scmp.lt.s32.totalorder %s444_s30, %s444_s30 }
  0x1e   :  { %p451_p0 = por %p450_p13, %p449_p12 }
  0x20   :  { %p452_p1 = pnand %p451_p0, %p445_p11 }
  0x22   :  { %455 = shalt.err (!%p452_p1)
}
  0x23   :  { %39 = dma.hbm_to_vmem [thread:$0]  %s871_s1, 96, %s37_s12, [#allocation6]  }
  0x24   :  { %566 = dma.done.wait [#allocation3], 160  }
  0x25   :  { %567 = vsyncadd [#allocation3], 4294967136 }
  0x26   :  { %568 = dma.done.wait [#allocation6], 96  }
  0x27   :  { %569 = vsyncadd [#allocation6], 4294967200  ;;  %v52_v0 = vlaneseq  ;;  %vm319_vm0 = vcmask 582656   ;;  %vm252_vm1 = vcmask 261120   ;;  %v188_v13 = vld [vmem:[#allocation5] sm:$0x3f] }
  0x28   :  { %v308_v14 = vld [vmem:[%s873_s3] sm:$0x3]  ;;  %s578_s3 = smov [#allocation11]   ;;  %s579_s13 = smov [#allocation8]   ;;  %v62_v46 = vld [vmem:[#allocation2 + $0x8] sm:$0x3] }
  0x29   :  { %v659_v1 = vshrl.u32 %v52_v0, 7  ;;  %v61_v29 = vld [vmem:[#allocation2] sm:$0xff]  ;;  %s369_s12 = sshll.u32 %s578_s3, 4  ;;  %s349_s14 = sshll.u32 %s579_s13, 4  ;;  %vm179_vm2 = vcmask 523264   ;;  %s707_s12 = int_to_ptr.vmem [resolvable:$true] %s369_s12  ;;  %s718_s14 = int_to_ptr.vmem [resolvable:$true] %s349_s14 }
  0x2a   :  { %s456_s15 = scalar_lea.vmem %s707_s12, 32  ;;  %p461_p3 = scmp.lt.s32.totalorder %s707_s12, %s707_s12 }
  0x2b   :  { %v662_v2 = vcvt.s32.f32 %v659_v1  ;;  %v665_v3 = vsub.s32 0, %v659_v1  ;;  %v668_v4 = vsub.s32 1, %v659_v1  ;;  %v671_v5 = vsub.s32 2, %v659_v1  ;;  %p457_p2 = scmp.ne.s32.totalorder %s707_s12, %s456_s15  ;;  %p462_p4 = scmp.lt.s32.totalorder %s456_s15, %s456_s15 }
  0x2c   :  { %v674_v6 = vsub.s32 3, %v659_v1  ;;  %v75_v7 = vsub.s32 4, %v659_v1  ;;  %v130_v8 = vsub.s32 5, %v659_v1  ;;  %v79_v12 = vsub.s32 6, %v659_v1 }
  0x2d   :  { %v186_v9 = vmul.f32 16.0, %v662_v2  ;;  %v306_v10 = vmul.f32 64.0, %v662_v2  ;;  %v57_v11 = vmul.f32 8.0, %v662_v2  ;;  %v134_v15 = vsub.s32 7, %v659_v1  ;;  %p463_p5 = por %p462_p4, %p461_p3 }
  0x2e   :  { %v687_v16 = vadd.s32 8, %v659_v1  ;;  %v193_v18 = vrot.slane %v188_v13, %v665_v3  ;;  %v223_v19 = vrot.slane %v188_v13, %v668_v4  ;;  %v197_v20 = vrot.slane %v188_v13, %v671_v5 }
  0x2f   :  { %v187_v17 = vadd.f32 8.0, %v186_v9  ;;  %v227_v21 = vrot.slane %v188_v13, %v674_v6  ;;  %v201_v22 = vrot.slane %v188_v13, %v75_v7  ;;  %v231_v23 = vrot.slane %v188_v13, %v130_v8  ;;  %p464_p6 = pnand %p463_p5, %p457_p2 }
  0x30   :  { %v307_v24 = vadd.f32 32.0, %v306_v10  ;;  %v208_v25 = vrot.slane %v193_v18, %v665_v3  ;;  %v238_v26 = vrot.slane %v223_v19, %v668_v4  ;;  %v212_v27 = vrot.slane %v197_v20, %v665_v3 }
  0x31   :  { %v312_v28 = vrot.slane %v308_v14, %v665_v3  ;;  %v242_v30 = vrot.slane %v227_v21, %v668_v4  ;;  %v216_v31 = vrot.slane %v201_v22, %v665_v3  ;;  %v246_v32 = vrot.slane %v231_v23, %v668_v4 }
  0x32   :  { %v317_v33 = vrot.slane %v308_v14, %v668_v4  ;;  %v217_v34 = vmul.f32 %v208_v25, %v187_v17  ;;  %v218_v35 = vmul.f32 %v212_v27, %v187_v17  ;;  %v701_v37 = vadd.f32 4.0, %v57_v11 }
  0x33   :  { %v313_v36 = vmul.f32 %v312_v28, %v307_v24  ;;  %v219_v38 = vmul.f32 %v216_v31, %v187_v17  ;;  %v68_v39 = vrot.slane %v61_v29, %v665_v3  ;;  %v123_v40 = vrot.slane %v61_v29, %v668_v4 }
  0x34   :  { %v72_v41 = vrot.slane %v61_v29, %v671_v5  ;;  %v247_v42 = vadd.f32 %v238_v26, %v217_v34  ;;  %v248_v43 = vadd.f32 %v242_v30, %v218_v35  ;;  %v127_v45 = vrot.slane %v61_v29, %v674_v6 }
  0x35   :  { %v318_v44 = vadd.f32 %v317_v33, %v313_v36  ;;  %v249_v47 = vadd.f32 %v246_v32, %v219_v38  ;;  %v710_v48 = vrot.slane %v68_v39, %v665_v3  ;;  %v713_v49 = vrot.slane %v123_v40, %v668_v4 }
  0x36   :  { %v716_v50 = vrot.slane %v72_v41, %v665_v3  ;;  %250 = vst [vmem:[#allocation8] sm:$0xff] %v247_v42  ;;  %251 = vst [vmem:[#allocation8 + $0x8] sm:$0xff] %v248_v43  ;;  %v722_v51 = vrot.slane %v127_v45, %v668_v4  ;;  %v76_v52 = vrot.slane %v61_v29, %v75_v7 }
  0x37   :  { %320 = vst.msk [vmem:[#allocation11] sm:$0x3] %vm319_vm0, %v318_v44  ;;  %v131_v53 = vrot.slane %v61_v29, %v130_v8  ;;  %v80_v54 = vrot.slane %v61_v29, %v79_v12  ;;  %v110_v55 = vmul.f32 %v710_v48, %v701_v37  ;;  %v135_v57 = vrot.slane %v61_v29, %v134_v15 }
  0x38   :  { %253 = vst.msk [vmem:[#allocation8 + $0x10] sm:$0xff] %vm252_vm1, %v249_v47  ;;  %v111_v56 = vmul.f32 %v716_v50, %v701_v37  ;;  %v84_v58 = vrot.slane %v62_v46, %v665_v3 }
  0x39   :  { %467 = shalt.err (!%p464_p6)
}
  0x3a   :  { %s468_s18 = scalar_lea.hbm %s878_s8, 32 }
  0x3b   :  { %p469_p7 = scmp.ne.s32.totalorder %s878_s8, %s468_s18  ;;  %p472_p8 = scmp.lt.u32.totalorder %s468_s18, %s878_s8 }
  0x3d   :  { %p474_p9 = pnand %p472_p8, %p469_p7 }
  0x3f   :  { %477 = shalt.err (!%p474_p9)
}
  0x40   :  { %372 = dma.vmem_to_hbm [thread:$0]  %s707_s12, 32, %s878_s8, [#allocation12]   ;;  %v101_v59 = vrot.slane %v76_v52, %v665_v3  ;;  %v749_v60 = vrot.slane %v131_v53, %v668_v4  ;;  %v105_v61 = vrot.slane %v80_v54, %v665_v3  ;;  %v139_v62 = vrot.slane %v62_v46, %v668_v4  ;;  %v256_v63 = vld [vmem:[%s872_s2] sm:$0xf] }
  0x41   :  { %s478_s27 = scalar_lea.vmem %s718_s14, 384  ;;  %p483_p11 = scmp.lt.s32.totalorder %s718_s14, %s718_s14 }
  0x42   :  { %p479_p10 = scmp.ne.s32.totalorder %s718_s14, %s478_s27  ;;  %p484_p12 = scmp.lt.s32.totalorder %s478_s27, %s478_s27 }
  0x44   :  { %p485_p13 = por %p484_p12, %p483_p11 }
  0x46   :  { %p486_p0 = pnand %p485_p13, %p479_p10 }
  0x48   :  { %489 = shalt.err (!%p486_p0)
}
  0x49   :  { %s490_s29 = scalar_lea.hbm %s876_s6, 384 }
  0x4a   :  { %p491_p1 = scmp.ne.s32.totalorder %s876_s6, %s490_s29  ;;  %p494_p2 = scmp.lt.u32.totalorder %s490_s29, %s876_s6 }
  0x4c   :  { %p496_p3 = pnand %p494_p2, %p491_p1 }
  0x4e   :  { %499 = shalt.err (!%p496_p3)
}
  0x4f   :  { %352 = dma.vmem_to_hbm [thread:$0]  %s718_s14, 384, %s876_s6, [#allocation9]   ;;  %v165_v0 = vadd.f32 %v713_v49, %v110_v55  ;;  %v166_v1 = vadd.f32 %v722_v51, %v111_v56  ;;  %v160_v7 = vrot.slane %v135_v57, %v668_v4  ;;  %v109_v8 = vrot.slane %v84_v58, %v665_v3 }
  0x50   :  { %vm302_vm3 = vcmask 1043456   ;;  %v112_v9 = vmul.f32 %v101_v59, %v701_v37  ;;  %v113_v10 = vmul.f32 %v105_v61, %v701_v37  ;;  %v164_v11 = vrot.slane %v139_v62, %v668_v4  ;;  %s581_s13 = smov [#allocation10]   ;;  %s582_s15 = smov [#allocation13]  }
  0x51   :  { %v56_v12 = vcvt.s32.f32 %v687_v16  ;;  %175 = vst [vmem:[#allocation7] sm:$0xff] %v165_v0  ;;  %176 = vst [vmem:[#allocation7 + $0x8] sm:$0xff] %v166_v1  ;;  %v114_v13 = vmul.f32 %v109_v8, %v701_v37  ;;  %v254_v14 = vmul.f32 32.0, %v662_v2  ;;  %v261_v15 = vrot.slane %v256_v63, %v665_v3  ;;  %v323_v16 = vld [vmem:[%s874_s4] sm:$0x3]  ;;  %s580_s4 = smov [#allocation7]  }
  0x52   :  { %v265_v17 = vrot.slane %v256_v63, %v671_v5  ;;  %v167_v18 = vadd.f32 %v749_v60, %v112_v9  ;;  %v168_v19 = vadd.f32 %v160_v7, %v113_v10  ;;  %v281_v21 = vrot.slane %v256_v63, %v668_v4  ;;  %s336_s12 = sshll.u32 %s580_s4, 4  ;;  %s359_s14 = sshll.u32 %s581_s13, 4  ;;  %s802_s12 = int_to_ptr.vmem [resolvable:$true] %s336_s12  ;;  %s811_s14 = int_to_ptr.vmem [resolvable:$true] %s359_s14 }
  0x53   :  { %v58_v20 = vmul.f32 8.0, %v56_v12  ;;  %v169_v22 = vadd.f32 %v164_v11, %v114_v13  ;;  %v255_v23 = vadd.f32 16.0, %v254_v14  ;;  %v271_v24 = vrot.slane %v261_v15, %v665_v3  ;;  %s379_s16 = sshll.u32 %s582_s15, 4  ;;  %s500_s17 = scalar_lea.vmem %s802_s12, 1280  ;;  %s813_s16 = int_to_ptr.vmem [resolvable:$true] %s379_s16 }
  0x54   :  { %v275_v25 = vrot.slane %v265_v17, %v665_v3  ;;  %177 = vst [vmem:[#allocation7 + $0x10] sm:$0xff] %v167_v18  ;;  %178 = vst [vmem:[#allocation7 + $0x18] sm:$0xff] %v168_v19  ;;  %v285_v5 = vrot.slane %v256_v63, %v674_v6  ;;  %v291_v27 = vrot.slane %v281_v21, %v668_v4  ;;  %v321_v28 = vmul.f32 128.0, %v662_v2  ;;  %p501_p4 = scmp.ne.s32.totalorder %s802_s12, %s500_s17  ;;  %p505_p5 = scmp.lt.s32.totalorder %s802_s12, %s802_s12 }
  0x55   :  { %v60_v26 = vadd.f32 4.0, %v58_v20  ;;  %180 = vst.msk [vmem:[#allocation7 + $0x20] sm:$0xff] %vm179_vm2, %v169_v22  ;;  %v276_v29 = vmul.f32 %v271_v24, %v255_v23  ;;  %vm303_vm4 = vcmask 130052   ;;  %v326_v31 = vrot.slane %v323_v16, 1  ;;  %p506_p6 = scmp.lt.s32.totalorder %s500_s17, %s500_s17 }
  0x56   :  { %v277_v30 = vmul.f32 %v275_v25, %v255_v23  ;;  %v295_v6 = vrot.slane %v285_v5, %v668_v4  ;;  %v322_v37 = vadd.f32 64.0, %v321_v28  ;;  %vm806_vm5 = vmor %vm303_vm4, %vm302_vm3  ;;  %vm329_vm6 = vcmask 286720  }
  0x57   :  { %v115_v32 = vmul.f32 %v710_v48, %v60_v26  ;;  %v116_v33 = vmul.f32 %v716_v50, %v60_v26  ;;  %v117_v3 = vmul.f32 %v101_v59, %v60_v26  ;;  %v118_v34 = vmul.f32 %v105_v61, %v60_v26  ;;  %p507_p7 = por %p506_p6, %p505_p5 }
  0x58   :  { %v119_v35 = vmul.f32 %v109_v8, %v60_v26  ;;  %v296_v36 = vadd.f32 %v291_v27, %v276_v29  ;;  %v297_v42 = vadd.f32 %v295_v6, %v277_v30  ;;  %v324_v43 = vmul.f32 %v323_v16, %v322_v37 }
  0x59   :  { %v170_v2 = vadd.f32 %v713_v49, %v115_v32  ;;  %v171_v38 = vadd.f32 %v722_v51, %v116_v33  ;;  %v172_v39 = vadd.f32 %v749_v60, %v117_v3  ;;  %v173_v40 = vadd.f32 %v160_v7, %v118_v34  ;;  %p508_p8 = pnand %p507_p7, %p501_p4 }
  0x5a   :  { %v174_v41 = vadd.f32 %v164_v11, %v119_v35  ;;  %v300_v44 = vcombine.low %v296_v36, %v297_v42  ;;  %v328_v45 = vadd.f32 %v326_v31, %v324_v43 }
  0x5b   :  { %181 = vst [vmem:[#allocation7 + $0x28] sm:$0xff] %v170_v2  ;;  %182 = vst [vmem:[#allocation7 + $0x30] sm:$0xff] %v171_v38 }
  0x5c   :  { %183 = vst [vmem:[#allocation7 + $0x38] sm:$0xff] %v172_v39  ;;  %184 = vst [vmem:[#allocation7 + $0x40] sm:$0xff] %v173_v40 }
  0x5d   :  { %185 = vst.msk [vmem:[#allocation7 + $0x48] sm:$0xff] %vm179_vm2, %v174_v41 }
  0x5e   :  { %511 = shalt.err (!%p508_p8)
}
  0x5f   :  { %s512_s20 = scalar_lea.hbm %s875_s5, 1280 }
  0x60   :  { %p513_p9 = scmp.ne.s32.totalorder %s875_s5, %s512_s20  ;;  %p516_p10 = scmp.lt.u32.totalorder %s512_s20, %s875_s5 }
  0x62   :  { %p518_p11 = pnand %p516_p10, %p513_p9 }
  0x64   :  { %521 = shalt.err (!%p518_p11)
}
  0x65   :  { %s583_s25 = smov 640   ;;  %s584_s26 = smov 40   ;;  %305 = vst.msk [vmem:[#allocation10] sm:$0xff] %vm806_vm5, %v300_v44 }
  0x66   :  { %342 = dma.vmem_to_hbm [thread:$0]  %s802_s12, 1280, %s875_s5, [#allocation4], %s583_s25, %s583_s25, %s584_s26   ;;  %330 = vst.msk [vmem:[#allocation13] sm:$0x1] %vm329_vm6, %v328_v45 }
  0x67   :  { %s522_s28 = scalar_lea.vmem %s811_s14, 128  ;;  %p527_p13 = scmp.lt.s32.totalorder %s811_s14, %s811_s14 }
  0x68   :  { %p523_p12 = scmp.ne.s32.totalorder %s811_s14, %s522_s28  ;;  %p528_p0 = scmp.lt.s32.totalorder %s522_s28, %s522_s28 }
  0x6a   :  { %p529_p1 = por %p528_p0, %p527_p13 }
  0x6c   :  { %p530_p2 = pnand %p529_p1, %p523_p12 }
  0x6e   :  { %533 = shalt.err (!%p530_p2)
}
  0x6f   :  { %s534_s0 = scalar_lea.hbm %s877_s7, 128 }
  0x70   :  { %p535_p3 = scmp.ne.s32.totalorder %s877_s7, %s534_s0  ;;  %p538_p4 = scmp.lt.u32.totalorder %s534_s0, %s877_s7 }
  0x72   :  { %p540_p5 = pnand %p538_p4, %p535_p3 }
  0x74   :  { %543 = shalt.err (!%p540_p5)
}
  0x75   :  { %362 = dma.vmem_to_hbm [thread:$0]  %s811_s14, 128, %s877_s7, [#allocation9]  }
  0x76   :  { %s544_s3 = scalar_lea.vmem %s813_s16, 16  ;;  %s548_s4 = scalar_lea.vmem %s813_s16, 32 }
  0x77   :  { %p545_p6 = scmp.ne.s32.totalorder %s813_s16, %s544_s3  ;;  %p549_p7 = scmp.lt.s32.totalorder %s813_s16, %s813_s16 }
  0x78   :  { %p550_p8 = scmp.lt.s32.totalorder %s548_s4, %s544_s3 }
  0x7a   :  { %p551_p9 = por %p550_p8, %p549_p7 }
  0x7c   :  { %p552_p10 = pnand %p551_p9, %p545_p6 }
  0x7e   :  { %555 = shalt.err (!%p552_p10)
}
  0x7f   :  { %s556_s15 = scalar_lea.hbm %s879_s9, 16 }
  0x80   :  { %p557_p11 = scmp.ne.s32.totalorder %s879_s9, %s556_s15  ;;  %p560_p12 = scmp.lt.u32.totalorder %s556_s15, %s879_s9 }
  0x82   :  { %p562_p13 = pnand %p560_p12, %p557_p11 }
  0x84   :  { %565 = shalt.err (!%p562_p13)
}
  0x85   :  { %382 = dma.vmem_to_hbm [thread:$0]  %s813_s16, 16, %s879_s9, [#allocation12]  }
  0x86   :  { %570 = dma.done.wait [#allocation4], 1280  }
  0x87   :  { %571 = vsyncadd [#allocation4], 4294966016 }
  0x88   :  { %572 = dma.done.wait [#allocation9], 512  }
  0x89   :  { %573 = vsyncadd [#allocation9], 4294966784 }
  0x8a   :  { %574 = dma.done.wait [#allocation12], 48  }
  0x8b   :  { %575 = vsyncadd [#allocation12], 4294967248 }
  0x8c   :  { %398 = vsyncpa [#allocation3], 1 }
  0x8d   :  { %399 = vsyncpa [#allocation6], 1 }
  0x8e   :  { %400 = vsyncpa [#allocation4], 1 }
  0x8f   :  { %401 = vsyncpa [#allocation9], 1 }
  0x90   :  { %402 = vsyncpa [#allocation12], 1 }

</bundles_post_ra>
